<compile_context>
chip_gen: v7x
topology: tpu7x:2x2x1
jax: 0.10.0
libtpu: 0.0.40
codegen_flags: <defaults>
</compile_context>

<pallas_src>
import jax
import jax.numpy as jnp
import numpy as np
from jax.experimental import pallas as pl
from jax.experimental.pallas import tpu as pltpu

LATENT = 128          # fixed by the module (torch.eye(128))
ONE_HOT_IDX = 13      # self.mean_tensors(np.zeros(128), np.ones(128), 13)

# lanes of the per-tile partial-sum output row
_KL_T, _KL_S, _BCE, _ENT = 0, 1, 2, 3


def _softmax_pair(x):
    """Fused softmax + log-softmax: one exp, one log, one approx reciprocal."""
    m = jnp.max(x, axis=1, keepdims=True)
    sh = x - m
    e = jnp.exp(sh)
    z = jnp.sum(e, axis=1, keepdims=True)
    p = e * pl.reciprocal(z, approx=True)
    log_p = sh - jnp.log(z)
    return p, log_p


def _log_softmax(x):
    m = jnp.max(x, axis=1, keepdims=True)
    sh = x - m
    return sh - jnp.log(jnp.sum(jnp.exp(sh), axis=1, keepdims=True))


def ortho_loss_kernel(params_ref,   # (3, Bt, 128)  [mean_t, mean_s, log_std_t]
                      noise_ref,    # (4, Bt, 128)  [eps_pt, eps_ps, eps_et, eps_es]
                      y_zt_ref,     # (CY, Bt)      BCE logits, lane-dense
                      target_ref,   # (CY, Bt)
                      s_zt_ref,     # (CS, Bt)      sensitive logits, classes on sublanes
                      out_ref):     # (1, 128)      partial sums in lanes 0..3
    f32 = jnp.float32

    # ---- L_t partial: BCEWithLogits elementwise sum over this tile ----
    x = y_zt_ref[...].astype(f32)
    y = target_ref[...].astype(f32)
    # log1p(exp(-|x|)) == log(1 + exp(-|x|)); the argument is in (0, 1] so the
    # plain log is numerically fine (and guaranteed to lower in Mosaic).
    bce_sum = jnp.sum(jnp.maximum(x, 0.0) - x * y
                      + jnp.log(1.0 + jnp.exp(-jnp.abs(x))))

    # ---- Loss_e partial: -sum softmax * log_softmax over classes (axis 0) ----
    s = s_zt_ref[...].astype(f32)
    ssh = s - jnp.max(s, axis=0, keepdims=True)
    se = jnp.exp(ssh)
    sz = jnp.sum(se, axis=0, keepdims=True)
    p_sen = se * pl.reciprocal(sz, approx=True)
    logp_sen = ssh - jnp.log(sz)
    ent_sum = -jnp.sum(p_sen * logp_sen)

    # ---- reparameterized samples (MultivariateNormal, diagonal covariance) ----
    mean_t = params_ref[0].astype(f32)
    mean_s = params_ref[1].astype(f32)
    log_std_t = params_ref[2].astype(f32)
    eps_pt = noise_ref[0].astype(f32)
    eps_ps = noise_ref[1].astype(f32)
    eps_et = noise_ref[2].astype(f32)
    eps_es = noise_ref[3].astype(f32)

    lane = jax.lax.broadcasted_iota(jnp.int32, (1, LATENT), 1)
    onehot = jnp.where(lane == ONE_HOT_IDX, 1.0, 0.0).astype(f32)

    # prior_t ~ N(onehot13, I), prior_s ~ N(1 - onehot13, I); the constant 1
    # drops out under log_softmax, so prior_s uses eps - onehot13 directly.
    prior_t = eps_pt + onehot
    prior_s = eps_ps - onehot

    # cov = diag(exp(log_std_t)) + 1e-6 I, used for BOTH enc samples.
    # TODO(synk): upstream torch code ignores log_std_s for enc_dis_s; mirrored here.
    std = jnp.sqrt(jnp.exp(log_std_t) + 1e-6)
    enc_t = mean_t + std * eps_et
    enc_s = mean_s + std * eps_es

    # ---- batchmean KLDiv partial sums: sum p * (log p - log q) ----
    p_t, logp_t = _softmax_pair(enc_t)
    kl_t = jnp.sum(p_t * (logp_t - _log_softmax(prior_t)))
    p_s, logp_s = _softmax_pair(enc_s)
    kl_s = jnp.sum(p_s * (logp_s - _log_softmax(prior_s)))

    # ---- emit a lane-dense (1, 128) partial-sum row (unmasked store) ----
    row = (jnp.where(lane == _KL_T, kl_t, 0.0)
           + jnp.where(lane == _KL_S, kl_s, 0.0)
           + jnp.where(lane == _BCE, bce_sum, 0.0)
           + jnp.where(lane == _ENT, ent_sum, 0.0))
    out_ref[...] = row


def _pick_batch_tile(batch, cap=1024):
    """Largest lane-aligned batch tile <= cap that evenly divides the batch."""
    if batch <= cap:
        return batch
    t = cap - cap % 128
    while t >= 128:
        if batch % t == 0:
            return t
        t -= 128
    return batch


def ortho_loss(inputs, target, current_step, noise,
               lambda_e, lambda_od, gamma_e, gamma_od, step_size,
               batch_tile_cap=1024):
    """inputs = ((mean_t, mean_s, log_std_t, log_std_s), (y_zt, s_zt, s_zs), (z1, z2)).

    `noise` is a single (4, B, 128) stack of standard-normal draws:
    [eps_prior_t, eps_prior_s, eps_enc_t, eps_enc_s].
    """
    (mean_t, mean_s, log_std_t, _log_std_s) = inputs[0]
    (y_zt, s_zt, _s_zs) = inputs[1]
    # z1/z2 only contribute the batch size (== noise.shape[1]) to the torch forward.

    B = noise.shape[1]
    CY = y_zt.shape[1]
    CS = s_zt.shape[1]

    # One DMA per logical group (ideally the encoder emits these pre-stacked).
    params = jnp.stack([mean_t, mean_s, log_std_t], axis=0)   # (3, B, 128)

    # Lane-dense layout for the tiny per-sample tensors (batch -> lane axis).
    y_zt_t = y_zt.T          # (CY, B)
    target_t = target.T      # (CY, B)
    s_zt_t = s_zt.T          # (CS, B)

    bt = _pick_batch_tile(B, batch_tile_cap)
    num_tiles = B // bt

    parts = pl.pallas_call(
        ortho_loss_kernel,
        out_shape=jax.ShapeDtypeStruct((num_tiles, LATENT), jnp.float32),
        grid=(num_tiles,),
        in_specs=[
            pl.BlockSpec((3, bt, LATENT), lambda i: (0, i, 0)),
            pl.BlockSpec((4, bt, LATENT), lambda i: (0, i, 0)),
            pl.BlockSpec((CY, bt), lambda i: (0, i)),
            pl.BlockSpec((CY, bt), lambda i: (0, i)),
            pl.BlockSpec((CS, bt), lambda i: (0, i)),
        ],
        out_specs=pl.BlockSpec((1, LATENT), lambda i: (i, 0)),
        compiler_params=pltpu.CompilerParams(
            dimension_semantics=("parallel",),
            vmem_limit_bytes=48 * 1024 * 1024),
    )(params, noise, y_zt_t, target_t, s_zt_t)

    sums = jnp.sum(parts, axis=0)                 # lanes 4..127 are zero
    L_t = sums[_BCE] / (B * CY)                   # BCE mean over all elements
    Loss_e = sums[_ENT] / B
    L_zt = sums[_KL_T] / B                        # KLDiv 'batchmean'
    L_zs = sums[_KL_S] / B

    lam_e = lambda_e * gamma_e ** (current_step / step_size)
    lam_od = lambda_od * gamma_od ** (current_step / step_size)
    return L_t + lam_od * (L_zt + L_zs) + lam_e * Loss_e


def ortho_loss_ref(inputs, target, current_step, noise,
                   lambda_e, lambda_od, gamma_e, gamma_od, step_size):
    """Pure-JAX reference mirroring the torch forward (same reparameterized noise)."""
    (mean_t, mean_s, log_std_t, _), (y_zt, s_zt, _), _ = inputs
    eps_pt, eps_ps, eps_et, eps_es = noise
    x, y = y_zt, target
    L_t = jnp.mean(jnp.maximum(x, 0.0) - x * y + jnp.log1p(jnp.exp(-jnp.abs(x))))
    p = jax.nn.softmax(s_zt, axis=1)
    Loss_e = -jnp.sum(p * jax.nn.log_softmax(s_zt, axis=1)) / s_zt.shape[0]
    mean_1 = jnp.zeros((LATENT,), jnp.float32).at[ONE_HOT_IDX].set(1.0)
    mean_2 = jnp.ones((LATENT,), jnp.float32).at[ONE_HOT_IDX].set(0.0)
    prior_t = mean_1[None, :] + eps_pt
    prior_s = mean_2[None, :] + eps_ps
    std = jnp.sqrt(jnp.exp(log_std_t) + 1e-6)
    enc_t = mean_t + std * eps_et
    enc_s = mean_s + std * eps_es
    B = prior_t.shape[0]

    def kld(log_q, pp):
        return jnp.sum(pp * (jnp.log(pp) - log_q)) / B

    L_zt = kld(jax.nn.log_softmax(prior_t, axis=1), jax.nn.softmax(enc_t, axis=1))
    L_zs = kld(jax.nn.log_softmax(prior_s, axis=1), jax.nn.softmax(enc_s, axis=1))
    lam_e = lambda_e * gamma_e ** (current_step / step_size)
    lam_od = lambda_od * gamma_od ** (current_step / step_size)
    return L_t + lam_od * (L_zt + L_zs) + lam_e * Loss_e


if __name__ == "__main__":
    B, CY, CS = 8, 1, 2                         # batch, BCE logits, sensitive classes
    key = jax.random.PRNGKey(0)
    ks = jax.random.split(key, 12)

    mean_t = jax.random.normal(ks[0], (B, LATENT), jnp.float32) * 0.1
    mean_s = jax.random.normal(ks[1], (B, LATENT), jnp.float32) * 0.1
    log_std_t = jax.random.normal(ks[2], (B, LATENT), jnp.float32) * 0.05
    log_std_s = jax.random.normal(ks[3], (B, LATENT), jnp.float32) * 0.05
    y_zt = jax.random.normal(ks[4], (B, CY), jnp.float32)
    s_zt = jax.random.normal(ks[5], (B, CS), jnp.float32)
    s_zs = jax.random.normal(ks[6], (B, CS), jnp.float32)
    z1 = jax.random.normal(ks[7], (B, LATENT), jnp.float32)
    z2 = jax.random.normal(ks[8], (B, LATENT), jnp.float32)
    target = jax.random.bernoulli(ks[9], 0.5, (B, CY)).astype(jnp.float32)

    # Single (4, B, 128) standard-normal draw for all reparameterized samples.
    # TODO(synk): torch.distributions sampling RNG has no Pallas equivalent; the
    # noise is drawn here and the mean + chol(diag cov) * eps transform runs in-kernel.
    noise = jax.random.normal(ks[10], (4, B, LATENT), jnp.float32)

    inputs = ((mean_t, mean_s, log_std_t, log_std_s), (y_zt, s_zt, s_zs), (z1, z2))
    hparams = dict(lambda_e=1.0, lambda_od=0.063, gamma_e=2.0, gamma_od=1.4,
                   step_size=30.0)
    current_step = 10.0

    loss = ortho_loss(inputs, target, current_step, noise, **hparams)
    loss = jax.block_until_ready(loss)

    ref = ortho_loss_ref(inputs, target, current_step, noise, **hparams)
    # tolerance accounts for pl.reciprocal(approx=True) in the softmax denominators
    np.testing.assert_allclose(np.asarray(loss), np.asarray(ref), rtol=1e-3, atol=1e-3)
    print("KERNEL_OK")
</pallas_src>

<mosaic_0001>
module attributes {stable_mosaic.version = 11 : i64} {
  func.func @ortho_loss_kernel(%arg0: i32, %arg1: memref<3x8x128xf32, #tpu.memory_space<vmem>>, %arg2: memref<4x8x128xf32, #tpu.memory_space<vmem>>, %arg3: memref<1x8xf32, #tpu.memory_space<vmem>>, %arg4: memref<1x8xf32, #tpu.memory_space<vmem>>, %arg5: memref<2x8xf32, #tpu.memory_space<vmem>>, %arg6: memref<1x128xf32, #tpu.memory_space<vmem>>) attributes {dimension_semantics = [#tpu.dimension_semantics<parallel>], iteration_bounds = array<i64: 1>, scalar_prefetch = 0 : i64, scratch_operands = 0 : i64, tpu.core_type = #tpu.core_type<tc>, window_params = [{transform_indices = @transform_0, window_bounds = array<i64: 3, 8, 128>}, {transform_indices = @transform_1, window_bounds = array<i64: 4, 8, 128>}, {transform_indices = @transform_2, window_bounds = array<i64: 1, 8>}, {transform_indices = @transform_3, window_bounds = array<i64: 1, 8>}, {transform_indices = @transform_4, window_bounds = array<i64: 2, 8>}, {transform_indices = @transform_5, window_bounds = array<i64: 1, 128>}]} {
    %c0 = arith.constant 0 : index
    %c0_0 = arith.constant 0 : index
    %0 = vector.load %arg3[%c0, %c0_0] : memref<1x8xf32, #tpu.memory_space<vmem>>, vector<1x8xf32>
    %c0_1 = arith.constant 0 : index
    %c0_2 = arith.constant 0 : index
    %1 = vector.load %arg4[%c0_1, %c0_2] : memref<1x8xf32, #tpu.memory_space<vmem>>, vector<1x8xf32>
    %cst = arith.constant 0.000000e+00 : f32
    %2 = vector.broadcast %cst : f32 to vector<1x8xf32>
    %3 = arith.maximumf %0, %2 : vector<1x8xf32>
    %4 = arith.mulf %0, %1 : vector<1x8xf32>
    %5 = arith.subf %3, %4 : vector<1x8xf32>
    %6 = math.absf %0 : vector<1x8xf32>
    %cst_3 = arith.constant 0.000000e+00 : f32
    %7 = vector.broadcast %cst_3 : f32 to vector<1x8xf32>
    %8 = arith.subf %7, %6 : vector<1x8xf32>
    %9 = math.exp %8 : vector<1x8xf32>
    %cst_4 = arith.constant 1.000000e+00 : f32
    %10 = vector.broadcast %cst_4 : f32 to vector<1x8xf32>
    %11 = arith.addf %10, %9 : vector<1x8xf32>
    %12 = math.log %11 : vector<1x8xf32>
    %13 = arith.addf %5, %12 : vector<1x8xf32>
    %14 = vector.shape_cast %13 : vector<1x8xf32> to vector<1x1x8xf32>
    %cst_5 = arith.constant dense<0.000000e+00> : vector<1xf32>
    %15 = vector.multi_reduction <add>, %14, %cst_5 [1, 2] : vector<1x1x8xf32> to vector<1xf32>
    %16 = vector.shape_cast %15 : vector<1xf32> to vector<1x1x1xf32>
    %17 = vector.extract %16[0, 0, 0] : f32 from vector<1x1x1xf32>
    %c0_6 = arith.constant 0 : index
    %c0_7 = arith.constant 0 : index
    %18 = vector.load %arg5[%c0_6, %c0_7] : memref<2x8xf32, #tpu.memory_space<vmem>>, vector<2x8xf32>
    %cst_8 = arith.constant dense<0xFF800000> : vector<8xf32>
    %19 = vector.multi_reduction <maximumf>, %18, %cst_8 [0] : vector<2x8xf32> to vector<8xf32>
    %20 = vector.shape_cast %19 : vector<8xf32> to vector<1x8xf32>
    %21 = vector.broadcast %20 : vector<1x8xf32> to vector<2x8xf32>
    %22 = arith.subf %18, %21 : vector<2x8xf32>
    %23 = math.exp %22 : vector<2x8xf32>
    %cst_9 = arith.constant dense<0.000000e+00> : vector<8xf32>
    %24 = vector.multi_reduction <add>, %23, %cst_9 [0] : vector<2x8xf32> to vector<8xf32>
    %25 = vector.shape_cast %24 : vector<8xf32> to vector<1x8xf32>
    %26 = tpu.reciprocal %25 {approx = true} : vector<1x8xf32> -> vector<1x8xf32>
    %27 = vector.broadcast %26 : vector<1x8xf32> to vector<2x8xf32>
    %28 = arith.mulf %23, %27 : vector<2x8xf32>
    %29 = math.log %25 : vector<1x8xf32>
    %30 = vector.broadcast %29 : vector<1x8xf32> to vector<2x8xf32>
    %31 = arith.subf %22, %30 : vector<2x8xf32>
    %32 = arith.mulf %28, %31 : vector<2x8xf32>
    %33 = vector.shape_cast %32 : vector<2x8xf32> to vector<1x2x8xf32>
    %cst_10 = arith.constant dense<0.000000e+00> : vector<1xf32>
    %34 = vector.multi_reduction <add>, %33, %cst_10 [1, 2] : vector<1x2x8xf32> to vector<1xf32>
    %35 = vector.shape_cast %34 : vector<1xf32> to vector<1x1x1xf32>
    %36 = vector.extract %35[0, 0, 0] : f32 from vector<1x1x1xf32>
    %cst_11 = arith.constant 0.000000e+00 : f32
    %37 = arith.subf %cst_11, %36 : f32
    %c0_12 = arith.constant 0 : index
    %c0_13 = arith.constant 0 : index
    %c0_14 = arith.constant 0 : index
    %38 = vector.load %arg1[%c0_12, %c0_13, %c0_14] : memref<3x8x128xf32, #tpu.memory_space<vmem>>, vector<1x8x128xf32>
    %39 = vector.shape_cast %38 : vector<1x8x128xf32> to vector<8x128xf32>
    %c1 = arith.constant 1 : index
    %c0_15 = arith.constant 0 : index
    %c0_16 = arith.constant 0 : index
    %40 = vector.load %arg1[%c1, %c0_15, %c0_16] : memref<3x8x128xf32, #tpu.memory_space<vmem>>, vector<1x8x128xf32>
    %41 = vector.shape_cast %40 : vector<1x8x128xf32> to vector<8x128xf32>
    %c2 = arith.constant 2 : index
    %c0_17 = arith.constant 0 : index
    %c0_18 = arith.constant 0 : index
    %42 = vector.load %arg1[%c2, %c0_17, %c0_18] : memref<3x8x128xf32, #tpu.memory_space<vmem>>, vector<1x8x128xf32>
    %43 = vector.shape_cast %42 : vector<1x8x128xf32> to vector<8x128xf32>
    %c0_19 = arith.constant 0 : index
    %c0_20 = arith.constant 0 : index
    %c0_21 = arith.constant 0 : index
    %44 = vector.load %arg2[%c0_19, %c0_20, %c0_21] : memref<4x8x128xf32, #tpu.memory_space<vmem>>, vector<1x8x128xf32>
    %45 = vector.shape_cast %44 : vector<1x8x128xf32> to vector<8x128xf32>
    %c1_22 = arith.constant 1 : index
    %c0_23 = arith.constant 0 : index
    %c0_24 = arith.constant 0 : index
    %46 = vector.load %arg2[%c1_22, %c0_23, %c0_24] : memref<4x8x128xf32, #tpu.memory_space<vmem>>, vector<1x8x128xf32>
    %47 = vector.shape_cast %46 : vector<1x8x128xf32> to vector<8x128xf32>
    %c2_25 = arith.constant 2 : index
    %c0_26 = arith.constant 0 : index
    %c0_27 = arith.constant 0 : index
    %48 = vector.load %arg2[%c2_25, %c0_26, %c0_27] : memref<4x8x128xf32, #tpu.memory_space<vmem>>, vector<1x8x128xf32>
    %49 = vector.shape_cast %48 : vector<1x8x128xf32> to vector<8x128xf32>
    %c3 = arith.constant 3 : index
    %c0_28 = arith.constant 0 : index
    %c0_29 = arith.constant 0 : index
    %50 = vector.load %arg2[%c3, %c0_28, %c0_29] : memref<4x8x128xf32, #tpu.memory_space<vmem>>, vector<1x8x128xf32>
    %51 = vector.shape_cast %50 : vector<1x8x128xf32> to vector<8x128xf32>
    %52 = tpu.iota {dimensions = array<i32: 1>} : vector<1x128xi32>
    %c13_i32 = arith.constant 13 : i32
    %53 = vector.broadcast %c13_i32 : i32 to vector<1x128xi32>
    %54 = arith.cmpi eq, %52, %53 : vector<1x128xi32>
    %cst_30 = arith.constant 1.000000e+00 : f32
    %cst_31 = arith.constant 0.000000e+00 : f32
    %55 = vector.broadcast %cst_30 : f32 to vector<1x128xf32>
    %56 = vector.broadcast %cst_31 : f32 to vector<1x128xf32>
    %57 = arith.select %54, %55, %56 : vector<1x128xi1>, vector<1x128xf32>
    %58 = vector.broadcast %57 : vector<1x128xf32> to vector<8x128xf32>
    %59 = arith.addf %45, %58 : vector<8x128xf32>
    %60 = vector.broadcast %57 : vector<1x128xf32> to vector<8x128xf32>
    %61 = arith.subf %47, %60 : vector<8x128xf32>
    %62 = math.exp %43 : vector<8x128xf32>
    %cst_32 = arith.constant 9.99999997E-7 : f32
    %63 = vector.broadcast %cst_32 : f32 to vector<8x128xf32>
    %64 = arith.addf %62, %63 : vector<8x128xf32>
    %65 = math.sqrt %64 : vector<8x128xf32>
    %66 = arith.mulf %65, %49 : vector<8x128xf32>
    %67 = arith.addf %39, %66 : vector<8x128xf32>
    %68 = arith.mulf %65, %51 : vector<8x128xf32>
    %69 = arith.addf %41, %68 : vector<8x128xf32>
    %cst_33 = arith.constant dense<0xFF800000> : vector<8xf32>
    %70 = vector.multi_reduction <maximumf>, %67, %cst_33 [1] : vector<8x128xf32> to vector<8xf32>
    %71 = vector.shape_cast %70 : vector<8xf32> to vector<8x1xf32>
    %72 = vector.broadcast %71 : vector<8x1xf32> to vector<8x128xf32>
    %73 = arith.subf %67, %72 : vector<8x128xf32>
    %74 = math.exp %73 : vector<8x128xf32>
    %cst_34 = arith.constant dense<0.000000e+00> : vector<8xf32>
    %75 = vector.multi_reduction <add>, %74, %cst_34 [1] : vector<8x128xf32> to vector<8xf32>
    %76 = vector.shape_cast %75 : vector<8xf32> to vector<8x1xf32>
    %77 = tpu.reciprocal %76 {approx = true} : vector<8x1xf32> -> vector<8x1xf32>
    %78 = vector.broadcast %77 : vector<8x1xf32> to vector<8x128xf32>
    %79 = arith.mulf %74, %78 : vector<8x128xf32>
    %80 = math.log %76 : vector<8x1xf32>
    %81 = vector.broadcast %80 : vector<8x1xf32> to vector<8x128xf32>
    %82 = arith.subf %73, %81 : vector<8x128xf32>
    %cst_35 = arith.constant dense<0xFF800000> : vector<8xf32>
    %83 = vector.multi_reduction <maximumf>, %59, %cst_35 [1] : vector<8x128xf32> to vector<8xf32>
    %84 = vector.shape_cast %83 : vector<8xf32> to vector<8x1xf32>
    %85 = vector.broadcast %84 : vector<8x1xf32> to vector<8x128xf32>
    %86 = arith.subf %59, %85 : vector<8x128xf32>
    %87 = math.exp %86 : vector<8x128xf32>
    %cst_36 = arith.constant dense<0.000000e+00> : vector<8xf32>
    %88 = vector.multi_reduction <add>, %87, %cst_36 [1] : vector<8x128xf32> to vector<8xf32>
    %89 = vector.shape_cast %88 : vector<8xf32> to vector<8x1xf32>
    %90 = math.log %89 : vector<8x1xf32>
    %91 = vector.broadcast %90 : vector<8x1xf32> to vector<8x128xf32>
    %92 = arith.subf %86, %91 : vector<8x128xf32>
    %93 = arith.subf %82, %92 : vector<8x128xf32>
    %94 = arith.mulf %79, %93 : vector<8x128xf32>
    %95 = vector.shape_cast %94 : vector<8x128xf32> to vector<1x8x128xf32>
    %cst_37 = arith.constant dense<0.000000e+00> : vector<1xf32>
    %96 = vector.multi_reduction <add>, %95, %cst_37 [1, 2] : vector<1x8x128xf32> to vector<1xf32>
    %97 = vector.shape_cast %96 : vector<1xf32> to vector<1x1x1xf32>
    %98 = vector.extract %97[0, 0, 0] : f32 from vector<1x1x1xf32>
    %cst_38 = arith.constant dense<0xFF800000> : vector<8xf32>
    %99 = vector.multi_reduction <maximumf>, %69, %cst_38 [1] : vector<8x128xf32> to vector<8xf32>
    %100 = vector.shape_cast %99 : vector<8xf32> to vector<8x1xf32>
    %101 = vector.broadcast %100 : vector<8x1xf32> to vector<8x128xf32>
    %102 = arith.subf %69, %101 : vector<8x128xf32>
    %103 = math.exp %102 : vector<8x128xf32>
    %cst_39 = arith.constant dense<0.000000e+00> : vector<8xf32>
    %104 = vector.multi_reduction <add>, %103, %cst_39 [1] : vector<8x128xf32> to vector<8xf32>
    %105 = vector.shape_cast %104 : vector<8xf32> to vector<8x1xf32>
    %106 = tpu.reciprocal %105 {approx = true} : vector<8x1xf32> -> vector<8x1xf32>
    %107 = vector.broadcast %106 : vector<8x1xf32> to vector<8x128xf32>
    %108 = arith.mulf %103, %107 : vector<8x128xf32>
    %109 = math.log %105 : vector<8x1xf32>
    %110 = vector.broadcast %109 : vector<8x1xf32> to vector<8x128xf32>
    %111 = arith.subf %102, %110 : vector<8x128xf32>
    %cst_40 = arith.constant dense<0xFF800000> : vector<8xf32>
    %112 = vector.multi_reduction <maximumf>, %61, %cst_40 [1] : vector<8x128xf32> to vector<8xf32>
    %113 = vector.shape_cast %112 : vector<8xf32> to vector<8x1xf32>
    %114 = vector.broadcast %113 : vector<8x1xf32> to vector<8x128xf32>
    %115 = arith.subf %61, %114 : vector<8x128xf32>
    %116 = math.exp %115 : vector<8x128xf32>
    %cst_41 = arith.constant dense<0.000000e+00> : vector<8xf32>
    %117 = vector.multi_reduction <add>, %116, %cst_41 [1] : vector<8x128xf32> to vector<8xf32>
    %118 = vector.shape_cast %117 : vector<8xf32> to vector<8x1xf32>
    %119 = math.log %118 : vector<8x1xf32>
    %120 = vector.broadcast %119 : vector<8x1xf32> to vector<8x128xf32>
    %121 = arith.subf %115, %120 : vector<8x128xf32>
    %122 = arith.subf %111, %121 : vector<8x128xf32>
    %123 = arith.mulf %108, %122 : vector<8x128xf32>
    %124 = vector.shape_cast %123 : vector<8x128xf32> to vector<1x8x128xf32>
    %cst_42 = arith.constant dense<0.000000e+00> : vector<1xf32>
    %125 = vector.multi_reduction <add>, %124, %cst_42 [1, 2] : vector<1x8x128xf32> to vector<1xf32>
    %126 = vector.shape_cast %125 : vector<1xf32> to vector<1x1x1xf32>
    %127 = vector.extract %126[0, 0, 0] : f32 from vector<1x1x1xf32>
    %c0_i32 = arith.constant 0 : i32
    %128 = vector.broadcast %c0_i32 : i32 to vector<1x128xi32>
    %129 = arith.cmpi eq, %52, %128 : vector<1x128xi32>
    %cst_43 = arith.constant 0.000000e+00 : f32
    %130 = vector.broadcast %98 : f32 to vector<1x128xf32>
    %131 = vector.broadcast %cst_43 : f32 to vector<1x128xf32>
    %132 = arith.select %129, %130, %131 : vector<1x128xi1>, vector<1x128xf32>
    %c1_i32 = arith.constant 1 : i32
    %133 = vector.broadcast %c1_i32 : i32 to vector<1x128xi32>
    %134 = arith.cmpi eq, %52, %133 : vector<1x128xi32>
    %cst_44 = arith.constant 0.000000e+00 : f32
    %135 = vector.broadcast %127 : f32 to vector<1x128xf32>
    %136 = vector.broadcast %cst_44 : f32 to vector<1x128xf32>
    %137 = arith.select %134, %135, %136 : vector<1x128xi1>, vector<1x128xf32>
    %138 = arith.addf %132, %137 : vector<1x128xf32>
    %c2_i32 = arith.constant 2 : i32
    %139 = vector.broadcast %c2_i32 : i32 to vector<1x128xi32>
    %140 = arith.cmpi eq, %52, %139 : vector<1x128xi32>
    %cst_45 = arith.constant 0.000000e+00 : f32
    %141 = vector.broadcast %17 : f32 to vector<1x128xf32>
    %142 = vector.broadcast %cst_45 : f32 to vector<1x128xf32>
    %143 = arith.select %140, %141, %142 : vector<1x128xi1>, vector<1x128xf32>
    %144 = arith.addf %138, %143 : vector<1x128xf32>
    %c3_i32 = arith.constant 3 : i32
    %145 = vector.broadcast %c3_i32 : i32 to vector<1x128xi32>
    %146 = arith.cmpi eq, %52, %145 : vector<1x128xi32>
    %cst_46 = arith.constant 0.000000e+00 : f32
    %147 = vector.broadcast %37 : f32 to vector<1x128xf32>
    %148 = vector.broadcast %cst_46 : f32 to vector<1x128xf32>
    %149 = arith.select %146, %147, %148 : vector<1x128xi1>, vector<1x128xf32>
    %150 = arith.addf %144, %149 : vector<1x128xf32>
    %c0_47 = arith.constant 0 : index
    %c0_48 = arith.constant 0 : index
    %151 = vector.load %arg6[%c0_47, %c0_48] : memref<1x128xf32, #tpu.memory_space<vmem>>, vector<1x128xf32>
    tpu.vector_store %arg6[%c0_47, %c0_48], %150 {strides = array<i32>} : memref<1x128xf32, #tpu.memory_space<vmem>>, vector<1x128xf32>,
    return
  }
  func.func @transform_0(%arg0: i32) -> (i32, i32, i32) {
    %c0_i32 = arith.constant 0 : i32
    %c0_i32_0 = arith.constant 0 : i32
    %c0_i32_1 = arith.constant 0 : i32
    return %c0_i32, %arg0, %c0_i32_0 : i32, i32, i32
  }
  func.func @transform_1(%arg0: i32) -> (i32, i32, i32) {
    %c0_i32 = arith.constant 0 : i32
    %c0_i32_0 = arith.constant 0 : i32
    %c0_i32_1 = arith.constant 0 : i32
    return %c0_i32, %arg0, %c0_i32_0 : i32, i32, i32
  }
  func.func @transform_2(%arg0: i32) -> (i32, i32) {
    %c0_i32 = arith.constant 0 : i32
    %c0_i32_0 = arith.constant 0 : i32
    return %c0_i32, %arg0 : i32, i32
  }
  func.func @transform_3(%arg0: i32) -> (i32, i32) {
    %c0_i32 = arith.constant 0 : i32
    %c0_i32_0 = arith.constant 0 : i32
    return %c0_i32, %arg0 : i32, i32
  }
  func.func @transform_4(%arg0: i32) -> (i32, i32) {
    %c0_i32 = arith.constant 0 : i32
    %c0_i32_0 = arith.constant 0 : i32
    return %c0_i32, %arg0 : i32, i32
  }
  func.func @transform_5(%arg0: i32) -> (i32, i32) {
    %c0_i32 = arith.constant 0 : i32
    %c0_i32_0 = arith.constant 0 : i32
    return %arg0, %c0_i32 : i32, i32
  }
}

</mosaic_0001>

<bundles_post_ra>
// kernel: tpu_custom_call.1
= control target key start
LH: loop header
LB: loop body
LE: loop exit
PB: predicated region body
PF: predicated region fallthrough
CT: control target
= control target key end

     0   :  { %10 = vsyncpa [#allocation3], 0  ;;  %s474_s0 = inlined_call_operand.hbm [shape: f32[3,8,128], index: 0, kind: input, shape index: {}]   ;;  %s475_s1 = inlined_call_operand.hbm [shape: f32[4,8,128], index: 1, kind: input, shape index: {}]   ;;  %s476_s2 = inlined_call_operand.vmem [shape: f32[1,8], index: 2, kind: input, shape index: {}]   ;;  %s477_s3 = inlined_call_operand.vmem [shape: f32[1,8], index: 3, kind: input, shape index: {}]   ;;  %s478_s4 = inlined_call_operand.vmem [shape: f32[2,8], index: 4, kind: input, shape index: {}]   ;;  %s479_s5 = inlined_call_operand.hbm [shape: f32[1,128], index: 5, kind: output, shape index: {}]  }
   0x1   :  { %11 = vsyncpa [#allocation6], 0 }
   0x2   :  { %12 = vsyncpa [#allocation4], 0  ;;  %s359_s18 = smov [#allocation2]   ;;  %s287_s22 = scalar_lea.hbm %s474_s0, 384 }
   0x3   :  { %s18_s19 = sshll.u32 %s359_s18, 4  ;;  %p288_p0 = scmp.ne.s32.totalorder %s474_s0, %s287_s22  ;;  %s19_s19 = int_to_ptr.vmem [resolvable:$true] %s18_s19 }
   0x4   :  { %p291_p1 = scmp.lt.u32.totalorder %s287_s22, %s474_s0 }
   0x6   :  { %p293_p2 = pnand %p291_p1, %p288_p0 }
   0x8   :  { %296 = shalt.err (!%p293_p2)
}
   0x9   :  { %s297_s27 = scalar_lea.vmem %s19_s19, 384  ;;  %p302_p4 = scmp.lt.s32.totalorder %s19_s19, %s19_s19 }
   0xa   :  { %p298_p3 = scmp.ne.s32.totalorder %s19_s19, %s297_s27  ;;  %p303_p5 = scmp.lt.s32.totalorder %s297_s27, %s297_s27 }
   0xc   :  { %p304_p6 = por %p303_p5, %p302_p4 }
   0xe   :  { %p305_p7 = pnand %p304_p6, %p298_p3 }
  0x10   :  { %308 = shalt.err (!%p305_p7)
}
  0x11   :  { %s360_s28 = smov 128   ;;  %s361_s29 = smov 8  }
  0x12   :  { %24 = dma.hbm_to_vmem [thread:$0]  %s474_s0, 384, %s19_s19, [#allocation3], %s360_s28, %s360_s28, %s361_s29  }
  0x13   :  { %s362_s7 = smov [#allocation5]   ;;  %s309_s11 = scalar_lea.hbm %s475_s1, 512 }
  0x14   :  { %s30_s8 = sshll.u32 %s362_s7, 4  ;;  %p310_p8 = scmp.ne.s32.totalorder %s475_s1, %s309_s11  ;;  %s31_s8 = int_to_ptr.vmem [resolvable:$true] %s30_s8 }
  0x15   :  { %p313_p9 = scmp.lt.u32.totalorder %s309_s11, %s475_s1 }
  0x17   :  { %p315_p10 = pnand %p313_p9, %p310_p8 }
  0x19   :  { %318 = shalt.err (!%p315_p10)
}
  0x1a   :  { %s319_s16 = scalar_lea.vmem %s31_s8, 512  ;;  %p324_p12 = scmp.lt.s32.totalorder %s31_s8, %s31_s8 }
  0x1b   :  { %p320_p11 = scmp.ne.s32.totalorder %s31_s8, %s319_s16  ;;  %p325_p13 = scmp.lt.s32.totalorder %s319_s16, %s319_s16 }
  0x1d   :  { %p326_p0 = por %p325_p13, %p324_p12 }
  0x1f   :  { %p327_p1 = pnand %p326_p0, %p320_p11 }
  0x21   :  { %330 = shalt.err (!%p327_p1)
}
  0x22   :  { %36 = dma.hbm_to_vmem [thread:$0]  %s475_s1, 512, %s31_s8, [#allocation6], %s360_s28, %s360_s28, %s361_s29  }
  0x23   :  { %353 = dma.done.wait [#allocation3], 384  }
  0x24   :  { %354 = vsyncadd [#allocation3], 4294966912 }
  0x25   :  { %355 = dma.done.wait [#allocation6], 512  }
  0x26   :  { %356 = vsyncadd [#allocation6], 4294966784  ;;  %v113_v0 = vld [vmem:[#allocation2 + $0x10] sm:$0xff]  ;;  %v121_v4 = vlaneseq  ;;  %v118_v9 = vld [vmem:[#allocation5 + $0x10] sm:$0xff]  ;;  %v363_v18 = vmov 0.0   ;;  %vm74_vm3 = vcmask 58368  }
  0x27   :  { %v127_v1 = vmul.f32 1.442695, %v113_v0  ;;  %v120_v10 = vld [vmem:[#allocation5 + $0x18] sm:$0xff]  ;;  %v109_v12 = vld [vmem:[#allocation2] sm:$0xff]  ;;  %v111_v14 = vld [vmem:[#allocation2 + $0x8] sm:$0xff]  ;;  %vm62_vm4 = vcmask 57344  }
  0x28   :  { %v419_v5 = vand.u32 127, %v121_v4  ;;  %v114_v17 = vld [vmem:[#allocation5] sm:$0xff]  ;;  %v116_v20 = vld [vmem:[#allocation5 + $0x8] sm:$0xff]  ;;  %s364_s25 = smov [#allocation7]  }
  0x29   :  { %253 = vpow2.f32 %v127_v1  ;;  %v73_v25 = vld [vmem:[%s478_s4] sm:$0x3]  ;;  %s229_s26 = sshll.u32 %s364_s25, 4  ;;  %s230_s26 = int_to_ptr.vmem [resolvable:$true] %s229_s26 }
  0x2a   :  { %vm123_vm2 = vcmp.eq.s32.totalorder %v419_v5, 13  ;;  %v75_v26 = vsel %vm74_vm3, %v73_v25, -inf  ;;  %v49_v47 = vld [vmem:[%s476_s2] sm:$0x1]  ;;  %vm207_vm5 = vcmp.eq.s32.totalorder %v419_v5, 0  ;;  %vm210_vm6 = vcmp.eq.s32.totalorder %v419_v5, 1  ;;  %p336_p3 = scmp.lt.s32.totalorder %s230_s26, %s230_s26 }
  0x2b   :  { %v124_v19 = vsel %vm123_vm2, 1.0, %v363_v18  ;;  %v76_v27 = vrot.slane %v75_v26, 4  ;;  %v54_v48 = vand.u32 2147483647, %v49_v47  ;;  %v51_v4 = vmax.f32 %v49_v47, 0.0  ;;  %s331_s27 = scalar_lea.vmem %s230_s26, 16 }
  0x2c   :  { %v125_v23 = vadd.f32 %v124_v19, %v114_v17  ;;  %v126_v24 = vsub.f32 %v116_v20, %v124_v19  ;;  %vm214_vm7 = vcmp.eq.s32.totalorder %v419_v5, 2  ;;  %vm218_vm8 = vcmp.eq.s32.totalorder %v419_v5, 3  ;;  %p332_p2 = scmp.ne.s32.totalorder %s230_s26, %s331_s27  ;;  %s335_s28 = scalar_lea.vmem %s230_s26, 32 }
  0x2d   :  { %v77_v28 = vmax.f32 %v75_v26, %v76_v27  ;;  %v55_v51 = vsub.f32 0.0, %v54_v48  ;;  %p337_p4 = scmp.lt.s32.totalorder %s335_s28, %s331_s27 }
  0x2f   :  { %v78_v29 = vrot.slane %v77_v28, 2  ;;  %v56_v54 = vmul.f32 1.442695, %v55_v51  ;;  %p338_p5 = por %p337_p4, %p336_p3 }
  0x31   :  { %v79_v30 = vmax.f32 %v77_v28, %v78_v29  ;;  %p339_p6 = pnand %p338_p5, %p332_p2 }
  0x33   :  { %v254_v2 = vpop.eup %253  ;;  %v80_v31 = vrot.slane %v79_v30, 1 }
  0x34   :  { %v129_v3 = vadd.f32 1e-06, %v254_v2  ;;  %v50_v2 = vld [vmem:[%s477_s3] sm:$0x1] }
  0x35   :  { %v81_v36 = vmax.f32 %v79_v30, %v80_v31 }
  0x36   :  { %255 = vrsqrt.f32 %v129_v3  ;;  %vm132_vm0 = vcmp.eq.f32.partialorder %v129_v3, inf  ;;  %v135_v7 = vand.u32 2147483648, %v129_v3  ;;  %vm134_vm1 = vcmp.eq.f32.partialorder %v129_v3, 0.0 }
  0x37   :  { %v82_v39 = vsub.f32 %v73_v25, %v81_v36 }
  0x39   :  { %v83_v44 = vmul.f32 1.442695, %v82_v39 }
  0x40   :  { %v256_v6 = vpop.eup %255 }
  0x41   :  { %v131_v8 = vmul.f32 %v256_v6, %v129_v3  ;;  %v52_v6 = vmul.f32 %v50_v2, %v49_v47 }
  0x43   :  { %v133_v11 = vsel %vm132_vm0, %v129_v3, %v131_v8 }
  0x44   :  { %v136_v13 = vsel %vm134_vm1, %v135_v7, %v133_v11  ;;  %v53_v11 = vsub.f32 %v51_v4, %v52_v6 }
  0x45   :  { %v137_v15 = vmul.f32 %v136_v13, %v118_v9  ;;  %v139_v16 = vmul.f32 %v136_v13, %v120_v10 }
  0x47   :  { %v138_v21 = vadd.f32 %v137_v15, %v109_v12  ;;  %v140_v22 = vadd.f32 %v139_v16, %v111_v14 }
  0x49   :  { %141 = vmax.xlane.f32.xlu0 %v138_v21  ;;  %174 = vmax.xlane.f32.xlu1 %v140_v22 }
  0x4d   :  { %153 = vmax.xlane.f32.xlu0 %v125_v23  ;;  %186 = vmax.xlane.f32.xlu1 %v126_v24 }
  0xd6   :  { %v142_v32 = vpop.xlane.xlu0 %141  ;;  %v175_v33 = vpop.xlane.xlu1 %174 }
  0xd7   :  { %v426_v34 = vsub.f32 %v138_v21, %v142_v32  ;;  %v428_v35 = vsub.f32 %v140_v22, %v175_v33 }
  0xd9   :  { %v144_v37 = vmul.f32 1.442695, %v426_v34  ;;  %v177_v38 = vmul.f32 1.442695, %v428_v35 }
  0xda   :  { %v154_v40 = vpop.xlane.xlu0 %153  ;;  %v187_v41 = vpop.xlane.xlu1 %186 }
  0xdb   :  { %257 = vpow2.f32 %v144_v37  ;;  %v432_v42 = vsub.f32 %v125_v23, %v154_v40  ;;  %v434_v43 = vsub.f32 %v126_v24, %v187_v41 }
  0xdc   :  { %259 = vpow2.f32 %v177_v38 }
  0xdd   :  { %v156_v45 = vmul.f32 1.442695, %v432_v42  ;;  %v189_v46 = vmul.f32 1.442695, %v434_v43  ;;  %261 = vpow2.f32 %v83_v44 }
  0xdf   :  { %263 = vpow2.f32 %v156_v45 }
  0xe0   :  { %265 = vpow2.f32 %v189_v46 }
  0xe1   :  { %267 = vpow2.f32 %v56_v54 }
  0xe5   :  { %v441_v49 = vpop.eup %257 }
  0xe6   :  { %v443_v50 = vpop.eup %259  ;;  %146 = vadd.xlane.f32.xlu0 %v441_v49 }
  0xe7   :  { %v262_v52 = vpop.eup %261 }
  0xe8   :  { %v85_v53 = vsel %vm74_vm3, %v262_v52, 0.0 }
  0xe9   :  { %v264_v55 = vpop.eup %263  ;;  %v86_v56 = vrot.slane %v85_v53, 4 }
  0xea   :  { %179 = vadd.xlane.f32.xlu0 %v443_v50  ;;  %158 = vadd.xlane.f32.xlu1 %v264_v55  ;;  %v266_v57 = vpop.eup %265 }
  0xeb   :  { %v87_v58 = vadd.f32 %v86_v56, %v85_v53  ;;  %v268_v63 = vpop.eup %267 }
  0xec   :  { %v58_v0 = vadd.f32 1.0, %v268_v63 }
  0xed   :  { %v88_v59 = vrot.slane %v87_v58, 2 }
  0xee   :  { %191 = vadd.xlane.f32.xlu1 %v266_v57 }
  0xef   :  { %v89_v60 = vadd.f32 %v88_v59, %v87_v58 }
  0xf1   :  { %v90_v61 = vrot.slane %v89_v60, 1 }
  0xf3   :  { %v91_v62 = vadd.f32 %v90_v61, %v89_v60 }
  0xf5   :  { %269 = vlog2.f32 %v91_v62 }
  0xf6   :  { %271 = vrcp.f32 %v91_v62 }
  0xf7   :  { %273 = vlog2.f32 %v58_v0 }
  0xff   :  { %v270_v1 = vpop.eup %269 }
 0x100   :  { %v95_v3 = vmul.f32 0.6931472, %v270_v1  ;;  %v272_v7 = vpop.eup %271 }
 0x101   :  { %v274_v8 = vpop.eup %273  ;;  %v93_v9 = vmul.f32 %v272_v7, %v262_v52 }
 0x102   :  { %v96_v10 = vsub.f32 %v82_v39, %v95_v3  ;;  %v60_v12 = vmul.f32 0.6931472, %v274_v8 }
 0x104   :  { %v97_v13 = vmul.f32 %v96_v10, %v93_v9  ;;  %v61_v14 = vadd.f32 %v60_v12, %v53_v11 }
 0x106   :  { %v98_v15 = vsel %vm74_vm3, %v97_v13, 0.0  ;;  %v63_v16 = vsel %vm62_vm4, %v61_v14, 0.0 }
 0x107   :  { %99 = vadd.xlane.f32.xlu1 %v98_v15  ;;  %64 = vadd.xlane.f32.xlu0 %v63_v16 }
 0x173   :  { %v147_v17 = vpop.xlane.xlu0 %146 }
 0x174   :  { %275 = vlog2.f32 %v147_v17 }
 0x177   :  { %v159_v18 = vpop.xlane.xlu1 %158  ;;  %v180_v19 = vpop.xlane.xlu0 %179 }
 0x178   :  { %277 = vlog2.f32 %v159_v18 }
 0x179   :  { %279 = vrcp.f32 %v147_v17 }
 0x17a   :  { %281 = vlog2.f32 %v180_v19 }
 0x17b   :  { %v192_v20 = vpop.xlane.xlu1 %191 }
 0x17c   :  { %283 = vlog2.f32 %v192_v20 }
 0x17d   :  { %285 = vrcp.f32 %v180_v19 }
 0x17e   :  { %v276_v21 = vpop.eup %275 }
 0x17f   :  { %v151_v22 = vmul.f32 0.6931472, %v276_v21 }
 0x181   :  { %v152_v29 = vsub.f32 %v426_v34, %v151_v22 }
 0x182   :  { %v278_v23 = vpop.eup %277 }
 0x183   :  { %v280_v24 = vpop.eup %279  ;;  %v161_v25 = vmul.f32 0.6931472, %v278_v23 }
 0x184   :  { %v282_v26 = vpop.eup %281  ;;  %v149_v32 = vmul.f32 %v280_v24, %v441_v49 }
 0x185   :  { %v162_v27 = vsub.f32 %v432_v42, %v161_v25  ;;  %v184_v28 = vmul.f32 0.6931472, %v282_v26 }
 0x186   :  { %v284_v30 = vpop.eup %283 }
 0x187   :  { %v194_v31 = vmul.f32 0.6931472, %v284_v30  ;;  %v163_v33 = vsub.f32 %v152_v29, %v162_v27  ;;  %v286_v36 = vpop.eup %285  ;;  %v185_v39 = vsub.f32 %v428_v35, %v184_v28 }
 0x188   :  { %v182_v40 = vmul.f32 %v286_v36, %v443_v50 }
 0x189   :  { %v195_v37 = vsub.f32 %v434_v43, %v194_v31  ;;  %v164_v38 = vmul.f32 %v163_v33, %v149_v32 }
 0x18b   :  { %165 = vadd.xlane.f32.xlu0 %v164_v38  ;;  %v196_v41 = vsub.f32 %v185_v39, %v195_v37 }
 0x18d   :  { %v197_v44 = vmul.f32 %v196_v41, %v182_v40 }
 0x18f   :  { %198 = vadd.xlane.f32.xlu1 %v197_v44 }
 0x194   :  { %v100_v42 = vpop.xlane.xlu1 %99  ;;  %v65_v34 = vpop.xlane.xlu0 %64 }
 0x195   :  { %v101_v45 = vrot.slane %v100_v42, 4  ;;  %v66_v46 = vrot.slane %v65_v34, 4 }
 0x197   :  { %v102_v47 = vadd.f32 %v101_v45, %v100_v42  ;;  %v67_v48 = vadd.f32 %v66_v46, %v65_v34 }
 0x199   :  { %v103_v49 = vrot.slane %v102_v47, 2  ;;  %v68_v51 = vrot.slane %v67_v48, 2 }
 0x19b   :  { %v104_v52 = vadd.f32 %v103_v49, %v102_v47  ;;  %v69_v53 = vadd.f32 %v68_v51, %v67_v48 }
 0x19d   :  { %v105_v43 = vrot.slane %v104_v52, 1  ;;  %v70_v54 = vrot.slane %v69_v53, 1 }
 0x19f   :  { %v106_v55 = vadd.f32 %v105_v43, %v104_v52  ;;  %v71_v35 = vadd.f32 %v70_v54, %v69_v53 }
 0x1a1   :  { %239 = vpush %v71_v35 }
 0x1a2   :  { %241 = vpush %v106_v55 }
 0x1d2   :  { %s240_s3 = spop %239 }
 0x1d3   :  { %s242_s21 = spop %241  ;;  %v215_v7 = vstv %s240_s3 }
 0x1d4   :  { %s108_s23 = ssub.f32 0.0, %s242_s21  ;;  %v216_v13 = vsel %vm214_vm7, %v215_v7, 0.0 }
 0x1d6   :  { %v219_v11 = vstv %s108_s23 }
 0x1d7   :  { %v220_v15 = vsel %vm218_vm8, %v219_v11, 0.0 }
 0x218   :  { %v166_v50 = vpop.xlane.xlu0 %165 }
 0x219   :  { %v167_v56 = vrot.slane %v166_v50, 4 }
 0x21b   :  { %v168_v57 = vadd.f32 %v167_v56, %v166_v50 }
 0x21c   :  { %v199_v58 = vpop.xlane.xlu1 %198 }
 0x21d   :  { %v169_v59 = vrot.slane %v168_v57, 2  ;;  %v200_v60 = vrot.slane %v199_v58, 4 }
 0x21f   :  { %v170_v61 = vadd.f32 %v169_v59, %v168_v57  ;;  %v201_v62 = vadd.f32 %v200_v60, %v199_v58 }
 0x221   :  { %v202_v63 = vrot.slane %v201_v62, 2  ;;  %v171_v0 = vrot.slane %v170_v61, 1 }
 0x223   :  { %v203_v1 = vadd.f32 %v202_v63, %v201_v62  ;;  %v172_v2 = vadd.f32 %v171_v0, %v170_v61 }
 0x225   :  { %243 = vpush %v172_v2  ;;  %v204_v3 = vrot.slane %v203_v1, 1 }
 0x227   :  { %v205_v4 = vadd.f32 %v204_v3, %v203_v1 }
 0x229   :  { %245 = vpush %v205_v4 }
 0x256   :  { %s244_s22 = spop %243 }
 0x257   :  { %v208_v6 = vstv %s244_s22 }
 0x258   :  { %v209_v9 = vsel %vm207_vm5, %v208_v6, 0.0 }
 0x25a   :  { %s246_s24 = spop %245 }
 0x25b   :  { %v211_v8 = vstv %s246_s24 }
 0x25c   :  { %v212_v10 = vsel %vm210_vm6, %v211_v8, 0.0 }
 0x25d   :  { %v213_v12 = vadd.f32 %v212_v10, %v209_v9 }
 0x25f   :  { %v217_v14 = vadd.f32 %v216_v13, %v213_v12 }
 0x261   :  { %v221_v16 = vadd.f32 %v220_v15, %v217_v14 }
 0x263   :  { %222 = vst [vmem:[#allocation7] sm:$0x1] %v221_v16 }
 0x264   :  { %342 = shalt.err (!%p339_p6)
}
 0x265   :  { %s343_s6 = scalar_lea.hbm %s479_s5, 16 }
 0x266   :  { %p344_p7 = scmp.ne.s32.totalorder %s479_s5, %s343_s6  ;;  %p347_p8 = scmp.lt.u32.totalorder %s343_s6, %s479_s5 }
 0x268   :  { %p349_p9 = pnand %p347_p8, %p344_p7 }
 0x26a   :  { %352 = shalt.err (!%p349_p9)
}
 0x26b   :  { %232 = dma.vmem_to_hbm [thread:$0]  %s230_s26, 16, %s479_s5, [#allocation4]  }
 0x26c   :  { %357 = dma.done.wait [#allocation4], 16  }
 0x26d   :  { %358 = vsyncadd [#allocation4], 4294967280 }
 0x26e   :  { %236 = vsyncpa [#allocation3], 1 }
 0x26f   :  { %237 = vsyncpa [#allocation6], 1 }
 0x270   :  { %238 = vsyncpa [#allocation4], 1 }

</bundles_post_ra>
